<compile_context>
chip_gen: v7x
topology: tpu7x:2x2x1
jax: 0.10.0
libtpu: 0.0.40
codegen_flags: <defaults>
</compile_context>

<pallas_src>
import jax
import jax.numpy as jnp
from jax.experimental import pallas as pl
from jax.experimental.pallas import tpu as pltpu


def mlp_kernel(x_ref, w_in_ref, b_in_ref, w_h_ref, b_h_ref,
               w_c_ref, b_c_ref, o_ref):
    # x_ref: (TM, 1) tile of rows, f32
    x = x_ref[...]

    # input layer: K=1 contraction -> broadcasted VPU mul/add, keeps MXU free
    h = x * w_in_ref[...] + b_in_ref[...]          # (TM, H) f32

    # hidden stack: (TM,H) @ (H,H) + bias, ReLU — bf16 operands, f32 accum
    num_layers = w_h_ref.shape[0]                  # static
    for l in range(num_layers):
        h = jnp.dot(h.astype(jnp.bfloat16), w_h_ref[l],
                    preferred_element_type=jnp.float32)
        h = h + b_h_ref[l]
        h = jnp.maximum(h, 0.0)

    # classifier: lane-dense (TM,H) @ (H,C_pad); pad columns carry a -1e30
    # bias so they get zero probability after the softmax.
    logits = jnp.dot(h.astype(jnp.bfloat16), w_c_ref[...],
                     preferred_element_type=jnp.float32)
    logits = logits + b_c_ref[...]

    # softmax over labels (last dim), f32
    m = jnp.max(logits, axis=-1, keepdims=True)
    e = jnp.exp(logits - m)
    denom = jnp.sum(e, axis=-1, keepdims=True)
    o_ref[...] = (e * pl.reciprocal(denom, approx=True)).astype(o_ref.dtype)


def mlp_forward(x, params, *, tm=256):
    """x: (B, S, 1) float32 -> (B, S, num_labels) float32 softmax probs."""
    B, S, _ = x.shape
    w_in, b_in, w_h, b_h, w_c, b_c = params
    H = w_in.shape[1]
    L = w_h.shape[0]
    C = w_c.shape[1]

    # ---- lane-dense classifier padding (C -> multiple of 128) -------------
    C_pad = max(128, ((C + 127) // 128) * 128)
    w_c_p = jnp.zeros((H, C_pad), jnp.float32).at[:, :C].set(w_c)
    b_c_p = jnp.full((1, C_pad), -1e30, jnp.float32).at[:, :C].set(b_c)

    # bf16 MXU operands (f32 accumulation in the kernel); biases stay f32
    w_h_bf = w_h.astype(jnp.bfloat16)
    w_c_bf = w_c_p.astype(jnp.bfloat16)

    # ---- row tiling with tail padding --------------------------------------
    N = B * S
    N_pad = ((N + tm - 1) // tm) * tm
    x2d = x.reshape(N, 1)
    if N_pad != N:
        x2d = jnp.pad(x2d, ((0, N_pad - N), (0, 0)))

    out2d = pl.pallas_call(
        mlp_kernel,
        out_shape=jax.ShapeDtypeStruct((N_pad, C_pad), jnp.float32),
        grid_spec=pltpu.PrefetchScalarGridSpec(
            num_scalar_prefetch=0,
            grid=(N_pad // tm,),
            in_specs=[
                pl.BlockSpec((tm, 1), lambda i: (i, 0)),        # x rows
                pl.BlockSpec((1, H), lambda i: (0, 0)),         # w_in (1,H) f32
                pl.BlockSpec((1, H), lambda i: (0, 0)),         # b_in (1,H) f32
                pl.BlockSpec((L, H, H), lambda i: (0, 0, 0)),   # w_hid bf16
                pl.BlockSpec((L, 1, H), lambda i: (0, 0, 0)),   # b_hid f32
                pl.BlockSpec((H, C_pad), lambda i: (0, 0)),     # w_cls bf16
                pl.BlockSpec((1, C_pad), lambda i: (0, 0)),     # b_cls f32
            ],
            out_specs=pl.BlockSpec((tm, C_pad), lambda i: (i, 0)),
        ),
        compiler_params=pltpu.CompilerParams(
            dimension_semantics=("parallel",)),
    )(x2d, w_in, b_in, w_h_bf, b_h, w_c_bf, b_c_p)

    return out2d[:N, :C].reshape(B, S, C)


def mlp_reference(x, params):
    """Pure-JAX f32 reference of the PyTorch forward (for correctness)."""
    w_in, b_in, w_h, b_h, w_c, b_c = params
    h = x @ w_in + b_in                    # (B,S,H)
    for l in range(w_h.shape[0]):
        h = jnp.maximum(h @ w_h[l] + b_h[l], 0.0)
    logits = h @ w_c + b_c
    return jax.nn.softmax(logits, axis=2)


def init_params(key, hidden_size, num_labels, num_layers=1):
    """Deterministic synthetic params; weights stored as (in, out)."""
    k = jax.random.split(key, 6)
    w_in = jax.random.normal(k[0], (1, hidden_size), jnp.float32) * 0.1
    b_in = jax.random.normal(k[1], (1, hidden_size), jnp.float32) * 0.01
    w_h = jax.random.normal(k[2], (num_layers, hidden_size, hidden_size),
                            jnp.float32) * 0.05
    b_h = jax.random.normal(k[3], (num_layers, 1, hidden_size),
                            jnp.float32) * 0.01
    w_c = jax.random.normal(k[4], (hidden_size, num_labels), jnp.float32) * 0.05
    b_c = jax.random.normal(k[5], (1, num_labels), jnp.float32) * 0.01
    return (w_in, b_in, w_h, b_h, w_c, b_c)


if __name__ == "__main__":
    # Small, TPU-friendly shapes consistent with the module's forward:
    # hidden_size=128 (lane-aligned), num_labels=8, num_layers=1.
    # S=130 deliberately exercises the row-tail padding path, and N=520 gives
    # a multi-step grid (shards across v7x's 2 TensorCores).
    B, S = 4, 130
    HIDDEN = 128
    NUM_LABELS = 8
    NUM_LAYERS = 1

    key = jax.random.PRNGKey(0)
    kx, kp = jax.random.split(key)
    x = jax.random.normal(kx, (B, S, 1), jnp.float32)
    params = init_params(kp, HIDDEN, NUM_LABELS, NUM_LAYERS)

    out = mlp_forward(x, params)
    out = jax.block_until_ready(out)

    # sanity: shape, softmax rows sum to 1, matches f32 reference
    assert out.shape == (B, S, NUM_LABELS)
    assert jnp.allclose(jnp.sum(out, axis=2), 1.0, atol=1e-4)
    ref = mlp_reference(x, params)
    assert jnp.allclose(out, ref, atol=5e-2), float(jnp.abs(out - ref).max())

    print("KERNEL_OK")
</pallas_src>

<mosaic_0001>
module attributes {stable_mosaic.version = 11 : i64} {
  func.func @mlp_kernel(%arg0: i32, %arg1: memref<256x1xf32, #tpu.memory_space<vmem>>, %arg2: memref<1x128xf32, #tpu.memory_space<vmem>>, %arg3: memref<1x128xf32, #tpu.memory_space<vmem>>, %arg4: memref<1x128x128xbf16, #tpu.memory_space<vmem>>, %arg5: memref<1x1x128xf32, #tpu.memory_space<vmem>>, %arg6: memref<128x128xbf16, #tpu.memory_space<vmem>>, %arg7: memref<1x128xf32, #tpu.memory_space<vmem>>, %arg8: memref<256x128xf32, #tpu.memory_space<vmem>>) attributes {dimension_semantics = [#tpu.dimension_semantics<parallel>], iteration_bounds = array<i64: 3>, scalar_prefetch = 0 : i64, scratch_operands = 0 : i64, tpu.core_type = #tpu.core_type<tc>, window_params = [{transform_indices = @transform_0, window_bounds = array<i64: 256, 1>}, {pipeline_mode = #tpu.pipeline_mode<synchronous>, transform_indices = @transform_1, window_bounds = array<i64: 1, 128>}, {pipeline_mode = #tpu.pipeline_mode<synchronous>, transform_indices = @transform_2, window_bounds = array<i64: 1, 128>}, {pipeline_mode = #tpu.pipeline_mode<synchronous>, transform_indices = @transform_3, window_bounds = array<i64: 1, 128, 128>}, {pipeline_mode = #tpu.pipeline_mode<synchronous>, transform_indices = @transform_4, window_bounds = array<i64: 1, 1, 128>}, {pipeline_mode = #tpu.pipeline_mode<synchronous>, transform_indices = @transform_5, window_bounds = array<i64: 128, 128>}, {pipeline_mode = #tpu.pipeline_mode<synchronous>, transform_indices = @transform_6, window_bounds = array<i64: 1, 128>}, {transform_indices = @transform_7, window_bounds = array<i64: 256, 128>}]} {
    %c0 = arith.constant 0 : index
    %c0_0 = arith.constant 0 : index
    %0 = vector.load %arg1[%c0, %c0_0] : memref<256x1xf32, #tpu.memory_space<vmem>>, vector<256x1xf32>
    %c0_1 = arith.constant 0 : index
    %c0_2 = arith.constant 0 : index
    %1 = vector.load %arg2[%c0_1, %c0_2] : memref<1x128xf32, #tpu.memory_space<vmem>>, vector<1x128xf32>
    %2 = vector.broadcast %0 : vector<256x1xf32> to vector<256x128xf32>
    %3 = vector.broadcast %1 : vector<1x128xf32> to vector<256x128xf32>
    %4 = arith.mulf %2, %3 : vector<256x128xf32>
    %c0_3 = arith.constant 0 : index
    %c0_4 = arith.constant 0 : index
    %5 = vector.load %arg3[%c0_3, %c0_4] : memref<1x128xf32, #tpu.memory_space<vmem>>, vector<1x128xf32>
    %6 = vector.broadcast %5 : vector<1x128xf32> to vector<256x128xf32>
    %7 = arith.addf %4, %6 : vector<256x128xf32>
    %8 = arith.truncf %7 : vector<256x128xf32> to vector<256x128xbf16>
    %c0_5 = arith.constant 0 : index
    %c0_6 = arith.constant 0 : index
    %c0_7 = arith.constant 0 : index
    %9 = vector.load %arg4[%c0_5, %c0_6, %c0_7] : memref<1x128x128xbf16, #tpu.memory_space<vmem>>, vector<1x128x128xbf16>
    %10 = vector.shape_cast %9 : vector<1x128x128xbf16> to vector<128x128xbf16>
    %cst = arith.constant dense<0.000000e+00> : vector<256x128xf32>
    %11 = tpu.matmul %8, %10, %cst {dimension_numbers = #tpu.dot_dimension_numbers<[1], [0], [0], [1], [0, 0, 1, 1], [], []>} : vector<256x128xbf16>, vector<128x128xbf16>, vector<256x128xf32> -> vector<256x128xf32>
    %c0_8 = arith.constant 0 : index
    %c0_9 = arith.constant 0 : index
    %c0_10 = arith.constant 0 : index
    %12 = vector.load %arg5[%c0_8, %c0_9, %c0_10] : memref<1x1x128xf32, #tpu.memory_space<vmem>>, vector<1x1x128xf32>
    %13 = vector.shape_cast %12 : vector<1x1x128xf32> to vector<1x128xf32>
    %14 = vector.broadcast %13 : vector<1x128xf32> to vector<256x128xf32>
    %15 = arith.addf %11, %14 : vector<256x128xf32>
    %cst_11 = arith.constant 0.000000e+00 : f32
    %16 = vector.broadcast %cst_11 : f32 to vector<256x128xf32>
    %17 = arith.maximumf %15, %16 : vector<256x128xf32>
    %18 = arith.truncf %17 : vector<256x128xf32> to vector<256x128xbf16>
    %c0_12 = arith.constant 0 : index
    %c0_13 = arith.constant 0 : index
    %19 = vector.load %arg6[%c0_12, %c0_13] : memref<128x128xbf16, #tpu.memory_space<vmem>>, vector<128x128xbf16>
    %cst_14 = arith.constant dense<0.000000e+00> : vector<256x128xf32>
    %20 = tpu.matmul %18, %19, %cst_14 {dimension_numbers = #tpu.dot_dimension_numbers<[1], [0], [0], [1], [0, 0, 1, 1], [], []>} : vector<256x128xbf16>, vector<128x128xbf16>, vector<256x128xf32> -> vector<256x128xf32>
    %c0_15 = arith.constant 0 : index
    %c0_16 = arith.constant 0 : index
    %21 = vector.load %arg7[%c0_15, %c0_16] : memref<1x128xf32, #tpu.memory_space<vmem>>, vector<1x128xf32>
    %22 = vector.broadcast %21 : vector<1x128xf32> to vector<256x128xf32>
    %23 = arith.addf %20, %22 : vector<256x128xf32>
    %cst_17 = arith.constant dense<0xFF800000> : vector<256xf32>
    %24 = vector.multi_reduction <maximumf>, %23, %cst_17 [1] : vector<256x128xf32> to vector<256xf32>
    %25 = vector.shape_cast %24 : vector<256xf32> to vector<256x1xf32>
    %26 = vector.broadcast %25 : vector<256x1xf32> to vector<256x128xf32>
    %27 = arith.subf %23, %26 : vector<256x128xf32>
    %28 = math.exp %27 : vector<256x128xf32>
    %cst_18 = arith.constant dense<0.000000e+00> : vector<256xf32>
    %29 = vector.multi_reduction <add>, %28, %cst_18 [1] : vector<256x128xf32> to vector<256xf32>
    %30 = vector.shape_cast %29 : vector<256xf32> to vector<256x1xf32>
    %31 = tpu.reciprocal %30 {approx = true} : vector<256x1xf32> -> vector<256x1xf32>
    %32 = vector.broadcast %31 : vector<256x1xf32> to vector<256x128xf32>
    %33 = arith.mulf %28, %32 : vector<256x128xf32>
    %c0_19 = arith.constant 0 : index
    %c0_20 = arith.constant 0 : index
    %34 = vector.load %arg8[%c0_19, %c0_20] : memref<256x128xf32, #tpu.memory_space<vmem>>, vector<256x128xf32>
    tpu.vector_store %arg8[%c0_19, %c0_20], %33 {strides = array<i32>} : memref<256x128xf32, #tpu.memory_space<vmem>>, vector<256x128xf32>,
    return
  }
  func.func @transform_0(%arg0: i32) -> (i32, i32) {
    %c0_i32 = arith.constant 0 : i32
    %c0_i32_0 = arith.constant 0 : i32
    return %arg0, %c0_i32 : i32, i32
  }
  func.func @transform_1(%arg0: i32) -> (i32, i32) {
    %c0_i32 = arith.constant 0 : i32
    %c0_i32_0 = arith.constant 0 : i32
    %c0_i32_1 = arith.constant 0 : i32
    return %c0_i32, %c0_i32_0 : i32, i32
  }
  func.func @transform_2(%arg0: i32) -> (i32, i32) {
    %c0_i32 = arith.constant 0 : i32
    %c0_i32_0 = arith.constant 0 : i32
    %c0_i32_1 = arith.constant 0 : i32
    return %c0_i32, %c0_i32_0 : i32, i32
  }
  func.func @transform_3(%arg0: i32) -> (i32, i32, i32) {
    %c0_i32 = arith.constant 0 : i32
    %c0_i32_0 = arith.constant 0 : i32
    %c0_i32_1 = arith.constant 0 : i32
    %c0_i32_2 = arith.constant 0 : i32
    return %c0_i32, %c0_i32_0, %c0_i32_1 : i32, i32, i32
  }
  func.func @transform_4(%arg0: i32) -> (i32, i32, i32) {
    %c0_i32 = arith.constant 0 : i32
    %c0_i32_0 = arith.constant 0 : i32
    %c0_i32_1 = arith.constant 0 : i32
    %c0_i32_2 = arith.constant 0 : i32
    return %c0_i32, %c0_i32_0, %c0_i32_1 : i32, i32, i32
  }
  func.func @transform_5(%arg0: i32) -> (i32, i32) {
    %c0_i32 = arith.constant 0 : i32
    %c0_i32_0 = arith.constant 0 : i32
    %c0_i32_1 = arith.constant 0 : i32
    return %c0_i32, %c0_i32_0 : i32, i32
  }
  func.func @transform_6(%arg0: i32) -> (i32, i32) {
    %c0_i32 = arith.constant 0 : i32
    %c0_i32_0 = arith.constant 0 : i32
    %c0_i32_1 = arith.constant 0 : i32
    return %c0_i32, %c0_i32_0 : i32, i32
  }
  func.func @transform_7(%arg0: i32) -> (i32, i32) {
    %c0_i32 = arith.constant 0 : i32
    %c0_i32_0 = arith.constant 0 : i32
    return %arg0, %c0_i32 : i32, i32
  }
}

</mosaic_0001>

<bundles_post_ra>
// kernel: tpu_custom_call.1
= control target key start
LH: loop header
LB: loop body
LE: loop exit
PB: predicated region body
PF: predicated region fallthrough
CT: control target
= control target key end

     0   :  { %12 = vsyncpa [#allocation3], 0  ;;  %s2575_s0 = inlined_call_operand.vmem [shape: f32[768,1], index: 0, kind: input, shape index: {}]   ;;  %s2576_s1 = inlined_call_operand.vmem [shape: f32[1,128], index: 1, kind: input, shape index: {}]   ;;  %s2577_s2 = inlined_call_operand.vmem [shape: f32[1,128], index: 2, kind: input, shape index: {}]   ;;  %s2578_s3 = inlined_call_operand.vmem [shape: bf16[1,128,128], index: 3, kind: input, shape index: {}]   ;;  %s2579_s4 = inlined_call_operand.vmem [shape: f32[1,1,128], index: 4, kind: input, shape index: {}]   ;;  %s2580_s5 = inlined_call_operand.vmem [shape: bf16[128,128], index: 5, kind: input, shape index: {}]   ;;  %s2581_s6 = inlined_call_operand.vmem [shape: f32[1,128], index: 6, kind: input, shape index: {}]   ;;  %s2582_s7 = inlined_call_operand.hbm [shape: f32[768,128], index: 7, kind: output, shape index: {}]  }
   0x1   :  { %14 = vsyncpa [#allocation3 + $0x1], 0  ;;  %s1948_s24 = smov 0   ;;  %s1950_s25 = smov 0  }
   0x2   :  { %s1952_s26 = smov 0   ;;  %s1954_s27 = smov 0  }
   0x3 LB: > { %s1969_s28 = sadd.s32 4294967295, %s1902_s27   ;;  %s1475_s29 = sadd.s32 4294967294, %s1902_s27   ;;  %s1902_s27 = sphi %s1954_s27, %s2588_s27   ;;  %s1898_s26 = sphi %s1952_s26, %s2587_s26   ;;  %s1894_s25 = sphi %s1950_s25, %s2586_s25   ;;  %s1890_s24 = sphi %s1948_s24, %s2585_s24  }
   0x4   : > { %s1973_s30 = sadd.s32 1, %s1902_s27   ;;  %s179_s8 = sadd.s32 1, %s1898_s26 }
   0x5   : > { %s176_s9 = ssub.s32 %s1902_s27, %s1973_s30  ;;  %p189_p0 = scmp.ne.s32.totalorder %s1898_s26, %s1894_s25 }
   0x6   : > { %p177_p1 = scmp.eq.s32.totalorder %s176_s9, 0  ;;  %p190_p2 = scmp.eq.s32.totalorder %s1969_s28, 2 }
   0x7   : > { %p195_p3 = scmp.ne.s32.totalorder %s1894_s25, %s1890_s24  ;;  %p196_p4 = scmp.eq.s32.totalorder %s1475_s29, 2 }
   0x8   : > { %s1984_s10 = scalar_select %p177_p1, %s1898_s26, %s179_s8  }
   0x9   : > { %p1986_p5 = por %p190_p2, %p189_p0  ;;  %p1990_p6 = por %p196_p4, %p195_p3 }
   0xa   : > { %p1478_p7 = scmp.ge.s32.totalorder %s1902_s27, 1  ;;  %p241_p8 = scmp.lt.s32.totalorder %s1902_s27, 4 }
   0xc   : > { %p242_p9 = pnand %p1478_p7, %p241_p8 }
   0xd   : > { %s1480_s13 = sshll.u32 (!%p242_p9), %s1969_s28, 5  ;;  %v1904_v0 = vmov (!%p242_p9), 0   ;;  %v1696_v1 = vld [vmem:[%s2578_s3] sm:$0xff] (!%p242_p9)   ;;  %v1697_v2 = vld [vmem:[%s2578_s3 + $0x8] sm:$0xff] (!%p242_p9)   ;;  %v1698_v3 = vld [vmem:[%s2578_s3 + $0x10] sm:$0xff] (!%p242_p9)   ;;  %s270_s16 = sand.u32 (!%p242_p9), 1, %s1894_s25  }
   0xe   : > { %245 = sbr.rel (%p242_p9) target bundleno = 996 (0x3e4), region = 48  ;;  %1695 = vset.pattern.permute.xlu1 (!%p242_p9), %v1904_v0  ;;  %1694 = vset.pattern.permute.xlu0 (!%p242_p9), %v1904_v0  ;;  %p274_p10 = scmp.lt.s32.totalorder (!%p242_p9), %s1480_s13, 95  ;;  %v1699_v8 = vld [vmem:[%s2578_s3 + $0x18] sm:$0xff] (!%p242_p9)   ;;  %v1700_v11 = vld [vmem:[%s2578_s3 + $0x20] sm:$0xff] (!%p242_p9)   ;;  %v1701_v14 = vld [vmem:[%s2578_s3 + $0x28] sm:$0xff] (!%p242_p9)  }
   0xf   : > { %1556 = vmatprep.subr.bf16.mxu0 (!%p242_p9), %v1696_v1  ;;  %v1702_v17 = vld [vmem:[%s2578_s3 + $0x30] sm:$0xff] (!%p242_p9)   ;;  %v1703_v20 = vld [vmem:[%s2578_s3 + $0x38] sm:$0xff] (!%p242_p9)   ;;  %v1704_v41 = vld [vmem:[%s2580_s5] sm:$0xff] (!%p242_p9)   ;;  %s1479_s17 = sshll.u32 (!%p242_p9), %s270_s16, 8  ;;  %s1507_s19 = sshll.u32 (!%p242_p9), %s1969_s28, 12 }
  0x10   : > { %1557 = vmatpush3.bf16.msra.mxu0 (!%p242_p9), %v1696_v1  ;;  %v1705_v42 = vld [vmem:[%s2580_s5 + $0x8] sm:$0xff] (!%p242_p9)   ;;  %1604 = vmatprep.subr.bf16.mxu1 (!%p242_p9), %v1704_v41  ;;  %v1706_v43 = vld [vmem:[%s2580_s5 + $0x10] sm:$0xff] (!%p242_p9)   ;;  %v1707_v44 = vld [vmem:[%s2580_s5 + $0x18] sm:$0xff] (!%p242_p9)   ;;  %s2526_s29 = scalar_lea.hbm (!%p242_p9), %s2582_s7, %s1507_s19  ;;  %s2534_s8 = scalar_lea.sflag (!%p242_p9), [#allocation3], %s270_s16 }
  0x11   : > { %1558 = vmatprep.subr.bf16.mxu0 (!%p242_p9), %v1697_v2  ;;  %1605 = vmatpush3.bf16.msra.mxu1 (!%p242_p9), %v1704_v41  ;;  %v1708_v45 = vld [vmem:[%s2580_s5 + $0x20] sm:$0xff] (!%p242_p9)   ;;  %v1709_v46 = vld [vmem:[%s2580_s5 + $0x28] sm:$0xff] (!%p242_p9)   ;;  %s1905_s9 = smov (!%p242_p9), [#allocation2]  }
  0x12   : > { %1606 = vmatprep.subr.bf16.mxu1 (!%p242_p9), %v1705_v42  ;;  %v2079_v47 = vld [vmem:[%s2576_s1] ss:$0 sm:$0xff] (!%p242_p9) }
  0x13   : > { %v2086_v52 = vld [vmem:[%s2577_s2] ss:$0 sm:$0xff] (!%p242_p9) }
  0x14   : > { %1559 = vmatpush3.bf16.msra.mxu0 (!%p242_p9), %v1697_v2 }
  0x15   : > { %s2590_s13 = smov (!%p274_p10, %s1480_s13), 95  ;;  %1560 = vmatprep.subr.bf16.mxu0 %v1698_v3  ;;  %1607 = vmatpush3.bf16.msra.mxu1 %v1705_v42 }
  0x16   : > { %s1481_s18 = sshll.u32 %s2590_s13, 3  ;;  %1608 = vmatprep.subr.bf16.mxu1 %v1706_v43 }
  0x17   : > { %s2006_s21 = scalar_lea.vmem %s2575_s0, %s1481_s18  ;;  %s2458_s18 = scalar_lea.vmem [#allocation2], %s1479_s17 }
  0x18   : > { %v283_v4 = vld [vmem:[%s2006_s21 + $0x10] sm:$0xff]  ;;  %v281_v5 = vld [vmem:[%s2006_s21] sm:$0xff]  ;;  %v284_v6 = vld [vmem:[%s2006_s21 + $0x18] sm:$0xff]  ;;  %1561 = vmatpush3.bf16.msra.mxu0 %v1698_v3  ;;  %s1413_s20 = sshll.u32 %s2458_s18, 4  ;;  %s2528_s20 = int_to_ptr.vmem [resolvable:$true] %s1413_s20 }
  0x19   : > { %326 = vperm.xlu1 %1695, %v283_v4   ;;  %316 = vperm.xlu0 %1694, %v281_v5   ;;  %v282_v7 = vld [vmem:[%s2006_s21 + $0x8] sm:$0xff]  ;;  %v285_v10 = vld [vmem:[%s2006_s21 + $0x20] sm:$0xff]  ;;  %v288_v12 = vld [vmem:[%s2006_s21 + $0x38] sm:$0xff]  ;;  %s1840_s28 = scalar_lea.vmem %s2528_s20, 4096 }
  0x1a   : > { %v286_v9 = vld [vmem:[%s2006_s21 + $0x28] sm:$0xff]  ;;  %1562 = vmatprep.subr.bf16.mxu0 %v1699_v8  ;;  %v287_v13 = vld [vmem:[%s2006_s21 + $0x30] sm:$0xff]  ;;  %v289_v16 = vld [vmem:[%s2006_s21 + $0x40] sm:$0xff]  ;;  %1609 = vmatpush3.bf16.msra.mxu1 %v1706_v43  ;;  %p1841_p11 = scmp.ne.s32.totalorder %s2528_s20, %s1840_s28 }
  0x1b   : > { %v290_v15 = vld [vmem:[%s2006_s21 + $0x48] sm:$0xff]  ;;  %v292_v18 = vld [vmem:[%s2006_s21 + $0x58] sm:$0xff]  ;;  %v291_v19 = vld [vmem:[%s2006_s21 + $0x50] sm:$0xff]  ;;  %1610 = vmatprep.subr.bf16.mxu1 %v1707_v44 }
  0x1c   : > { %1563 = vmatpush3.bf16.msra.mxu0 %v1699_v8  ;;  %v294_v21 = vld [vmem:[%s2006_s21 + $0x68] sm:$0xff]  ;;  %v293_v22 = vld [vmem:[%s2006_s21 + $0x60] sm:$0xff]  ;;  %v296_v23 = vld [vmem:[%s2006_s21 + $0x78] sm:$0xff]  ;;  %p1842_p12 = pnand %p1841_p11, %p1986_p5 }
  0x1d   : > { %331 = vperm.xlu1 %1695, %v284_v6   ;;  %321 = vperm.xlu0 %1694, %v282_v7   ;;  %v295_v24 = vld [vmem:[%s2006_s21 + $0x70] sm:$0xff]  ;;  %v298_v25 = vld [vmem:[%s2006_s21 + $0x88] sm:$0xff]  ;;  %v297_v26 = vld [vmem:[%s2006_s21 + $0x80] sm:$0xff] }
  0x1e   : > { %1564 = vmatprep.subr.bf16.mxu0 %v1700_v11  ;;  %v300_v27 = vld [vmem:[%s2006_s21 + $0x98] sm:$0xff]  ;;  %v299_v28 = vld [vmem:[%s2006_s21 + $0x90] sm:$0xff]  ;;  %v302_v29 = vld [vmem:[%s2006_s21 + $0xa8] sm:$0xff]  ;;  %1611 = vmatpush3.bf16.msra.mxu1 %v1707_v44  ;;  %p1843_p13 = pneg %p1842_p12 }
  0x1f   : > { %v301_v30 = vld [vmem:[%s2006_s21 + $0xa0] sm:$0xff]  ;;  %v304_v31 = vld [vmem:[%s2006_s21 + $0xb8] sm:$0xff]  ;;  %v303_v32 = vld [vmem:[%s2006_s21 + $0xb0] sm:$0xff]  ;;  %1612 = vmatprep.subr.bf16.mxu1 %v1708_v45 }
  0x20   : > { %1565 = vmatpush3.bf16.msra.mxu0 %v1700_v11  ;;  %v306_v33 = vld [vmem:[%s2006_s21 + $0xc8] sm:$0xff]  ;;  %v305_v34 = vld [vmem:[%s2006_s21 + $0xc0] sm:$0xff]  ;;  %v308_v35 = vld [vmem:[%s2006_s21 + $0xd8] sm:$0xff] }
  0x21   : > { %341 = vperm.xlu1 %1695, %v286_v9   ;;  %336 = vperm.xlu0 %1694, %v285_v10   ;;  %v307_v36 = vld [vmem:[%s2006_s21 + $0xd0] sm:$0xff]  ;;  %v310_v37 = vld [vmem:[%s2006_s21 + $0xe8] sm:$0xff]  ;;  %v309_v38 = vld [vmem:[%s2006_s21 + $0xe0] sm:$0xff] }
  0x22   : > { %1566 = vmatprep.subr.bf16.mxu0 %v1701_v14  ;;  %v312_v39 = vld [vmem:[%s2006_s21 + $0xf8] sm:$0xff]  ;;  %v311_v40 = vld [vmem:[%s2006_s21 + $0xf0] sm:$0xff]  ;;  %1613 = vmatpush3.bf16.msra.mxu1 %v1708_v45  ;;  %s1844_s21 = sshll.u32 %s1905_s9, 4  ;;  %s1845_s21 = int_to_ptr.vmem [resolvable:$false] %s1844_s21 }
  0x23   : > { %1614 = vmatprep.subr.bf16.mxu1 %v1709_v46  ;;  %s1846_s13 = scalar_lea.vmem %s1845_s21, 8192  ;;  %p1847_p0 = scmp.lt.s32.totalorder %s2528_s20, %s1845_s21 }
  0x24   : > { %1567 = vmatpush3.bf16.msra.mxu0 %v1701_v14  ;;  %p1848_p1 = scmp.lt.s32.totalorder %s1846_s13, %s1840_s28 }
  0x25   : > { %351 = vperm.xlu1 %1695, %v288_v12   ;;  %346 = vperm.xlu0 %1694, %v287_v13  }
  0x26   : > { %1568 = vmatprep.subr.bf16.mxu0 %v1702_v17  ;;  %1615 = vmatpush3.bf16.msra.mxu1 %v1709_v46  ;;  %p1849_p2 = por %p1848_p1, %p1847_p0 }
  0x28   : > { %1569 = vmatpush3.bf16.msra.mxu0 %v1702_v17  ;;  %p1850_p3 = pnand %p1849_p2, %p1843_p13 }
  0x29   : > { %361 = vperm.xlu1 %1695, %v290_v15   ;;  %356 = vperm.xlu0 %1694, %v289_v16  }
  0x2a   : > { %1570 = vmatprep.subr.bf16.mxu0 %v1703_v20 }
  0x2c   : > { %1571 = vmatpush3.bf16.msra.mxu0 %v1703_v20 }
  0x2d   : > { %371 = vperm.xlu1 %1695, %v292_v18   ;;  %366 = vperm.xlu0 %1694, %v291_v19  }
  0x31   : > { %381 = vperm.xlu1 %1695, %v294_v21   ;;  %376 = vperm.xlu0 %1694, %v293_v22  }
  0x35   : > { %391 = vperm.xlu1 %1695, %v296_v23   ;;  %386 = vperm.xlu0 %1694, %v295_v24  }
  0x39   : > { %401 = vperm.xlu1 %1695, %v298_v25   ;;  %396 = vperm.xlu0 %1694, %v297_v26  }
  0x3d   : > { %411 = vperm.xlu1 %1695, %v300_v27   ;;  %406 = vperm.xlu0 %1694, %v299_v28  }
  0x41   : > { %421 = vperm.xlu1 %1695, %v302_v29   ;;  %416 = vperm.xlu0 %1694, %v301_v30  }
  0x45   : > { %431 = vperm.xlu1 %1695, %v304_v31   ;;  %426 = vperm.xlu0 %1694, %v303_v32  }
  0x49   : > { %441 = vperm.xlu1 %1695, %v306_v33   ;;  %436 = vperm.xlu0 %1694, %v305_v34  }
  0x4d   : > { %451 = vperm.xlu1 %1695, %v308_v35   ;;  %446 = vperm.xlu0 %1694, %v307_v36  }
  0x51   : > { %461 = vperm.xlu1 %1695, %v310_v37   ;;  %456 = vperm.xlu0 %1694, %v309_v38  }
  0x55   : > { %471 = vperm.xlu1 %1695, %v312_v39   ;;  %466 = vperm.xlu0 %1694, %v311_v40  }
  0x98   : > { %v327_v48 = vpop.permute.xlu1 %326  ;;  %v317_v49 = vpop.permute.xlu0 %316 }
  0x99   : > { %v482_v50 = vmul.f32 %v2079_v47, %v327_v48  ;;  %v480_v51 = vmul.f32 %v2079_v47, %v317_v49 }
  0x9b   : > { %v521_v57 = vadd.f32 %v2086_v52, %v482_v50  ;;  %v519_v59 = vadd.f32 %v2086_v52, %v480_v51 }
  0x9c   : > { %v332_v53 = vpop.permute.xlu1 %331  ;;  %v322_v54 = vpop.permute.xlu0 %321 }
  0x9d   : > { %v483_v55 = vmul.f32 %v2079_v47, %v332_v53  ;;  %v481_v56 = vmul.f32 %v2079_v47, %v322_v54 }
  0x9f   : > { %v522_v58 = vadd.f32 %v2086_v52, %v483_v55  ;;  %v520_v60 = vadd.f32 %v2086_v52, %v481_v56 }
  0xa0   : > { %v342_v61 = vpop.permute.xlu1 %341  ;;  %v337_v62 = vpop.permute.xlu0 %336 }
  0xa1   : > { %v485_v63 = vmul.f32 %v2079_v47, %v342_v61  ;;  %v484_v0 = vmul.f32 %v2079_v47, %v337_v62  ;;  %v551_v1 = vpack.c.bf16 %v520_v60, %v519_v59  ;;  %v552_v2 = vpack.c.bf16 %v522_v58, %v521_v57 }
  0xa3   : > { %v524_v3 = vadd.f32 %v2086_v52, %v485_v63  ;;  %v523_v4 = vadd.f32 %v2086_v52, %v484_v0  ;;  %1572 = vmatprep.mubr.bf16.mxu0 %v551_v1 }
  0xa4   : > { %v352_v5 = vpop.permute.xlu1 %351  ;;  %1573 = vmatmul.mubr.bf16.vlgmr.msra.gmra.mrb[0].mxu0 %v552_v2  ;;  %v347_v6 = vpop.permute.xlu0 %346 }
  0xa5   : > { %v487_v7 = vmul.f32 %v2079_v47, %v352_v5  ;;  %v486_v8 = vmul.f32 %v2079_v47, %v347_v6  ;;  %v553_v9 = vpack.c.bf16 %v524_v3, %v523_v4 }
  0xa7   : > { %v526_v10 = vadd.f32 %v2086_v52, %v487_v7  ;;  %v525_v11 = vadd.f32 %v2086_v52, %v486_v8  ;;  %1576 = vmatprep.mubr.bf16.mxu0 %v553_v9 }
  0xa8   : > { %v362_v12 = vpop.permute.xlu1 %361  ;;  %v357_v13 = vpop.permute.xlu0 %356 }
  0xa9   : > { %v489_v14 = vmul.f32 %v2079_v47, %v362_v12  ;;  %v488_v15 = vmul.f32 %v2079_v47, %v357_v13  ;;  %v554_v16 = vpack.c.bf16 %v526_v10, %v525_v11 }
  0xab   : > { %v528_v17 = vadd.f32 %v2086_v52, %v489_v14  ;;  %v527_v18 = vadd.f32 %v2086_v52, %v488_v15 }
  0xac   : > { %v372_v19 = vpop.permute.xlu1 %371  ;;  %1577 = vmatmul.mubr.bf16.gmra.mrb[4].mxu0 %v554_v16  ;;  %v367_v20 = vpop.permute.xlu0 %366 }
  0xad   : > { %v491_v21 = vmul.f32 %v2079_v47, %v372_v19  ;;  %v490_v22 = vmul.f32 %v2079_v47, %v367_v20  ;;  %v555_v23 = vpack.c.bf16 %v528_v17, %v527_v18 }
  0xaf   : > { %v530_v24 = vadd.f32 %v2086_v52, %v491_v21  ;;  %v529_v25 = vadd.f32 %v2086_v52, %v490_v22  ;;  %1580 = vmatprep.mubr.bf16.mxu0 %v555_v23 }
  0xb0   : > { %v382_v26 = vpop.permute.xlu1 %381  ;;  %v377_v27 = vpop.permute.xlu0 %376 }
  0xb1   : > { %v493_v28 = vmul.f32 %v2079_v47, %v382_v26  ;;  %v492_v29 = vmul.f32 %v2079_v47, %v377_v27  ;;  %v556_v30 = vpack.c.bf16 %v530_v24, %v529_v25 }
  0xb3   : > { %v532_v31 = vadd.f32 %v2086_v52, %v493_v28  ;;  %v531_v32 = vadd.f32 %v2086_v52, %v492_v29 }
  0xb4   : > { %v392_v33 = vpop.permute.xlu1 %391  ;;  %1581 = vmatmul.mubr.bf16.gmra.mrb[8].mxu0 %v556_v30  ;;  %v387_v34 = vpop.permute.xlu0 %386 }
  0xb5   : > { %v495_v35 = vmul.f32 %v2079_v47, %v392_v33  ;;  %v494_v36 = vmul.f32 %v2079_v47, %v387_v34  ;;  %v557_v37 = vpack.c.bf16 %v532_v31, %v531_v32 }
  0xb7   : > { %v534_v38 = vadd.f32 %v2086_v52, %v495_v35  ;;  %v533_v39 = vadd.f32 %v2086_v52, %v494_v36  ;;  %1584 = vmatprep.mubr.bf16.mxu0 %v557_v37  ;;  %v1710_v35 = vld [vmem:[%s2580_s5 + $0x30] sm:$0xff]   ;;  %v1711_v36 = vld [vmem:[%s2580_s5 + $0x38] sm:$0xff]  }
  0xb8   : > { %v402_v40 = vpop.permute.xlu1 %401  ;;  %v397_v41 = vpop.permute.xlu0 %396  ;;  %1616 = vmatprep.subr.bf16.mxu1 %v1710_v35 }
  0xb9   : > { %v497_v42 = vmul.f32 %v2079_v47, %v402_v40  ;;  %v496_v43 = vmul.f32 %v2079_v47, %v397_v41  ;;  %v558_v44 = vpack.c.bf16 %v534_v38, %v533_v39  ;;  %1617 = vmatpush3.bf16.msra.mxu1 %v1710_v35 }
  0xba   : > { %1618 = vmatprep.subr.bf16.mxu1 %v1711_v36 }
  0xbb   : > { %v536_v45 = vadd.f32 %v2086_v52, %v497_v42  ;;  %v535_v46 = vadd.f32 %v2086_v52, %v496_v43 }
  0xbc   : > { %v412_v48 = vpop.permute.xlu1 %411  ;;  %1585 = vmatmul.mubr.bf16.gmra.mrb[12].mxu0 %v558_v44  ;;  %v407_v49 = vpop.permute.xlu0 %406 }
  0xbd   : > { %v499_v50 = vmul.f32 %v2079_v47, %v412_v48  ;;  %v498_v51 = vmul.f32 %v2079_v47, %v407_v49  ;;  %v559_v53 = vpack.c.bf16 %v536_v45, %v535_v46  ;;  %1619 = vmatpush3.bf16.msra.mxu1 %v1711_v36 }
  0xbf   : > { %v538_v54 = vadd.f32 %v2086_v52, %v499_v50  ;;  %v537_v55 = vadd.f32 %v2086_v52, %v498_v51  ;;  %1588 = vmatprep.mubr.bf16.mxu0 %v559_v53 }
  0xc0   : > { %v422_v56 = vpop.permute.xlu1 %421  ;;  %v417_v57 = vpop.permute.xlu0 %416 }
  0xc1   : > { %v501_v58 = vmul.f32 %v2079_v47, %v422_v56  ;;  %v500_v59 = vmul.f32 %v2079_v47, %v417_v57  ;;  %v560_v60 = vpack.c.bf16 %v538_v54, %v537_v55 }
  0xc3   : > { %v540_v61 = vadd.f32 %v2086_v52, %v501_v58  ;;  %v539_v62 = vadd.f32 %v2086_v52, %v500_v59 }
  0xc4   : > { %v432_v63 = vpop.permute.xlu1 %431  ;;  %1589 = vmatmul.mubr.bf16.gmra.mrb[16].mxu0 %v560_v60  ;;  %v427_v0 = vpop.permute.xlu0 %426 }
  0xc5   : > { %v503_v1 = vmul.f32 %v2079_v47, %v432_v63  ;;  %v502_v2 = vmul.f32 %v2079_v47, %v427_v0  ;;  %v561_v3 = vpack.c.bf16 %v540_v61, %v539_v62 }
  0xc7   : > { %v542_v4 = vadd.f32 %v2086_v52, %v503_v1  ;;  %v541_v5 = vadd.f32 %v2086_v52, %v502_v2  ;;  %1592 = vmatprep.mubr.bf16.mxu0 %v561_v3 }
  0xc8   : > { %v442_v6 = vpop.permute.xlu1 %441  ;;  %v437_v7 = vpop.permute.xlu0 %436 }
  0xc9   : > { %v505_v8 = vmul.f32 %v2079_v47, %v442_v6  ;;  %v504_v9 = vmul.f32 %v2079_v47, %v437_v7  ;;  %v562_v10 = vpack.c.bf16 %v542_v4, %v541_v5 }
  0xcb   : > { %v544_v11 = vadd.f32 %v2086_v52, %v505_v8  ;;  %v543_v12 = vadd.f32 %v2086_v52, %v504_v9 }
  0xcc   : > { %v452_v13 = vpop.permute.xlu1 %451  ;;  %1593 = vmatmul.mubr.bf16.gmra.mrb[20].mxu0 %v562_v10  ;;  %v447_v14 = vpop.permute.xlu0 %446 }
  0xcd   : > { %v507_v15 = vmul.f32 %v2079_v47, %v452_v13  ;;  %v506_v16 = vmul.f32 %v2079_v47, %v447_v14  ;;  %v563_v17 = vpack.c.bf16 %v544_v11, %v543_v12 }
  0xcf   : > { %v546_v18 = vadd.f32 %v2086_v52, %v507_v15  ;;  %v545_v19 = vadd.f32 %v2086_v52, %v506_v16  ;;  %1596 = vmatprep.mubr.bf16.mxu0 %v563_v17 }
  0xd0   : > { %v462_v20 = vpop.permute.xlu1 %461  ;;  %v457_v21 = vpop.permute.xlu0 %456 }
  0xd1   : > { %v509_v22 = vmul.f32 %v2079_v47, %v462_v20  ;;  %v508_v23 = vmul.f32 %v2079_v47, %v457_v21  ;;  %v564_v24 = vpack.c.bf16 %v546_v18, %v545_v19 }
  0xd3   : > { %v548_v25 = vadd.f32 %v2086_v52, %v509_v22  ;;  %v547_v26 = vadd.f32 %v2086_v52, %v508_v23 }
  0xd4   : > { %v472_v27 = vpop.permute.xlu1 %471  ;;  %1597 = vmatmul.mubr.bf16.gmra.mrb[24].mxu0 %v564_v24  ;;  %v467_v28 = vpop.permute.xlu0 %466 }
  0xd5   : > { %v511_v29 = vmul.f32 %v2079_v47, %v472_v27  ;;  %v510_v30 = vmul.f32 %v2079_v47, %v467_v28  ;;  %v565_v31 = vpack.c.bf16 %v548_v25, %v547_v26  ;;  %v2159_v47 = vld [vmem:[%s2579_s4] ss:$0 sm:$0xff] }
  0xd7   : > { %v550_v32 = vadd.f32 %v2086_v52, %v511_v29  ;;  %v549_v33 = vadd.f32 %v2086_v52, %v510_v30  ;;  %1600 = vmatprep.mubr.bf16.mxu0 %v565_v31 }
  0xd9   : > { %v566_v34 = vpack.c.bf16 %v550_v32, %v549_v33 }
  0xdc   : > { %1601 = vmatmul.mubr.bf16.gmra.mrb[28].mxu0 %v566_v34 }
 0x177   : > { %v1574_v52 = vpop.f32.mrb[0].mxu0 }
 0x178   : > { %v681_v37 = vadd.f32 %v1574_v52, %v2159_v47  ;;  %v672_v38 = vpop.f32.mrb[1].mxu0 }
 0x179   : > { %v673_v39 = vadd.f32 %v2159_v47, %v672_v38  ;;  %v1575_v40 = vpop.f32.mrb[2].mxu0 }
 0x17a   : > { %v684_v41 = vadd.f32 %v1575_v40, %v2159_v47  ;;  %v675_v42 = vpop.f32.mrb[3].mxu0  ;;  %v801_v44 = vmax.f32 %v681_v37, 0.0 }
 0x17b   : > { %v676_v43 = vadd.f32 %v2159_v47, %v675_v42  ;;  %v799_v46 = vmax.f32 %v673_v39, 0.0 }
 0x17c   : > { %v802_v45 = vmax.f32 %v684_v41, 0.0 }
 0x17d   : > { %v800_v48 = vmax.f32 %v676_v43, 0.0 }
 0x17e   : > { %v832_v49 = vpack.c.bf16 %v802_v45, %v801_v44 }
 0x17f   : > { %v1578_v50 = vpop.f32.mrb[4].mxu0  ;;  %v831_v51 = vpack.c.bf16 %v800_v48, %v799_v46 }
 0x180   : > { %v697_v53 = vadd.f32 %v1578_v50, %v2159_v47  ;;  %v688_v54 = vpop.f32.mrb[5].mxu0 }
 0x181   : > { %v689_v55 = vadd.f32 %v2159_v47, %v688_v54  ;;  %v1579_v56 = vpop.f32.mrb[6].mxu0  ;;  %1620 = vmatprep.mubr.bf16.mxu1 %v831_v51 }
 0x182   : > { %v700_v57 = vadd.f32 %v1579_v56, %v2159_v47  ;;  %v691_v58 = vpop.f32.mrb[7].mxu0  ;;  %1621 = vmatmul.mubr.bf16.vlgmr.msra.gmra.mrb[0].mxu1 %v832_v49  ;;  %v805_v60 = vmax.f32 %v697_v53, 0.0 }
 0x183   : > { %v692_v59 = vadd.f32 %v2159_v47, %v691_v58  ;;  %v803_v62 = vmax.f32 %v689_v55, 0.0 }
 0x184   : > { %v806_v61 = vmax.f32 %v700_v57, 0.0 }
 0x185   : > { %v804_v63 = vmax.f32 %v692_v59, 0.0 }
 0x186   : > { %v834_v0 = vpack.c.bf16 %v806_v61, %v805_v60 }
 0x187   : > { %v833_v1 = vpack.c.bf16 %v804_v63, %v803_v62  ;;  %v1582_v2 = vpop.f32.mrb[8].mxu0 }
 0x188   : > { %v713_v3 = vadd.f32 %v1582_v2, %v2159_v47  ;;  %v704_v4 = vpop.f32.mrb[9].mxu0 }
 0x189   : > { %v705_v5 = vadd.f32 %v2159_v47, %v704_v4  ;;  %v1583_v6 = vpop.f32.mrb[10].mxu0  ;;  %1624 = vmatprep.mubr.bf16.mxu1 %v833_v1 }
 0x18a   : > { %v716_v7 = vadd.f32 %v1583_v6, %v2159_v47  ;;  %v707_v8 = vpop.f32.mrb[11].mxu0  ;;  %1625 = vmatmul.mubr.bf16.gmra.mrb[4].mxu1 %v834_v0  ;;  %v809_v10 = vmax.f32 %v713_v3, 0.0 }
 0x18b   : > { %v708_v9 = vadd.f32 %v2159_v47, %v707_v8  ;;  %v807_v12 = vmax.f32 %v705_v5, 0.0 }
 0x18c   : > { %v810_v11 = vmax.f32 %v716_v7, 0.0 }
 0x18d   : > { %v808_v13 = vmax.f32 %v708_v9, 0.0 }
 0x18e   : > { %v836_v14 = vpack.c.bf16 %v810_v11, %v809_v10 }
 0x18f   : > { %v835_v15 = vpack.c.bf16 %v808_v13, %v807_v12  ;;  %v1586_v16 = vpop.f32.mrb[12].mxu0 }
 0x190   : > { %v729_v17 = vadd.f32 %v1586_v16, %v2159_v47  ;;  %v720_v18 = vpop.f32.mrb[13].mxu0 }
 0x191   : > { %v721_v19 = vadd.f32 %v2159_v47, %v720_v18  ;;  %v1587_v20 = vpop.f32.mrb[14].mxu0  ;;  %1628 = vmatprep.mubr.bf16.mxu1 %v835_v15 }
 0x192   : > { %v732_v21 = vadd.f32 %v1587_v20, %v2159_v47  ;;  %v723_v22 = vpop.f32.mrb[15].mxu0  ;;  %1629 = vmatmul.mubr.bf16.gmra.mrb[8].mxu1 %v836_v14  ;;  %v813_v24 = vmax.f32 %v729_v17, 0.0 }
 0x193   : > { %v724_v23 = vadd.f32 %v2159_v47, %v723_v22  ;;  %v811_v26 = vmax.f32 %v721_v19, 0.0 }
 0x194   : > { %v814_v25 = vmax.f32 %v732_v21, 0.0 }
 0x195   : > { %v812_v27 = vmax.f32 %v724_v23, 0.0  ;;  %v2196_v23 = vld [vmem:[%s2581_s6] ss:$0 sm:$0xff] }
 0x196   : > { %v838_v28 = vpack.c.bf16 %v814_v25, %v813_v24 }
 0x197   : > { %v837_v29 = vpack.c.bf16 %v812_v27, %v811_v26  ;;  %v1590_v30 = vpop.f32.mrb[16].mxu0 }
 0x198   : > { %v745_v31 = vadd.f32 %v1590_v30, %v2159_v47  ;;  %v736_v32 = vpop.f32.mrb[17].mxu0 }
 0x199   : > { %v737_v33 = vadd.f32 %v2159_v47, %v736_v32  ;;  %v1591_v34 = vpop.f32.mrb[18].mxu0  ;;  %1632 = vmatprep.mubr.bf16.mxu1 %v837_v29 }
 0x19a   : > { %v748_v35 = vadd.f32 %v1591_v34, %v2159_v47  ;;  %v739_v36 = vpop.f32.mrb[19].mxu0  ;;  %1633 = vmatmul.mubr.bf16.gmra.mrb[12].mxu1 %v838_v28  ;;  %v817_v37 = vmax.f32 %v745_v31, 0.0 }
 0x19b   : > { %v740_v52 = vadd.f32 %v2159_v47, %v739_v36  ;;  %v815_v39 = vmax.f32 %v737_v33, 0.0 }
 0x19c   : > { %v818_v38 = vmax.f32 %v748_v35, 0.0 }
 0x19d   : > { %v816_v40 = vmax.f32 %v740_v52, 0.0 }
 0x19e   : > { %v840_v41 = vpack.c.bf16 %v818_v38, %v817_v37 }
 0x19f   : > { %v839_v42 = vpack.c.bf16 %v816_v40, %v815_v39  ;;  %v1594_v43 = vpop.f32.mrb[20].mxu0 }
 0x1a0   : > { %v761_v44 = vadd.f32 %v1594_v43, %v2159_v47  ;;  %v752_v45 = vpop.f32.mrb[21].mxu0 }
 0x1a1   : > { %v753_v46 = vadd.f32 %v2159_v47, %v752_v45  ;;  %v1595_v48 = vpop.f32.mrb[22].mxu0  ;;  %1636 = vmatprep.mubr.bf16.mxu1 %v839_v42 }
 0x1a2   : > { %v764_v49 = vadd.f32 %v1595_v48, %v2159_v47  ;;  %v755_v50 = vpop.f32.mrb[23].mxu0  ;;  %1637 = vmatmul.mubr.bf16.gmra.mrb[16].mxu1 %v840_v41  ;;  %v821_v53 = vmax.f32 %v761_v44, 0.0 }
 0x1a3   : > { %v756_v51 = vadd.f32 %v2159_v47, %v755_v50  ;;  %v819_v55 = vmax.f32 %v753_v46, 0.0 }
 0x1a4   : > { %v822_v54 = vmax.f32 %v764_v49, 0.0 }
 0x1a5   : > { %v820_v56 = vmax.f32 %v756_v51, 0.0 }
 0x1a6   : > { %v842_v57 = vpack.c.bf16 %v822_v54, %v821_v53 }
 0x1a7   : > { %v841_v58 = vpack.c.bf16 %v820_v56, %v819_v55  ;;  %v1598_v59 = vpop.f32.mrb[24].mxu0 }
 0x1a8   : > { %v777_v60 = vadd.f32 %v1598_v59, %v2159_v47  ;;  %v768_v61 = vpop.f32.mrb[25].mxu0 }
 0x1a9   : > { %v769_v62 = vadd.f32 %v2159_v47, %v768_v61  ;;  %v1599_v63 = vpop.f32.mrb[26].mxu0  ;;  %1640 = vmatprep.mubr.bf16.mxu1 %v841_v58 }
 0x1aa   : > { %v780_v0 = vadd.f32 %v1599_v63, %v2159_v47  ;;  %v771_v1 = vpop.f32.mrb[27].mxu0  ;;  %1641 = vmatmul.mubr.bf16.gmra.mrb[20].mxu1 %v842_v57  ;;  %v825_v3 = vmax.f32 %v777_v60, 0.0 }
 0x1ab   : > { %v772_v2 = vadd.f32 %v2159_v47, %v771_v1  ;;  %v823_v5 = vmax.f32 %v769_v62, 0.0 }
 0x1ac   : > { %v826_v4 = vmax.f32 %v780_v0, 0.0 }
 0x1ad   : > { %v824_v6 = vmax.f32 %v772_v2, 0.0 }
 0x1ae   : > { %v844_v7 = vpack.c.bf16 %v826_v4, %v825_v3 }
 0x1af   : > { %v843_v8 = vpack.c.bf16 %v824_v6, %v823_v5  ;;  %v1602_v9 = vpop.f32.mrb[28].mxu0 }
 0x1b0   : > { %v793_v10 = vadd.f32 %v1602_v9, %v2159_v47  ;;  %v784_v11 = vpop.f32.mrb[29].mxu0 }
 0x1b1   : > { %v785_v12 = vadd.f32 %v2159_v47, %v784_v11  ;;  %v1603_v13 = vpop.f32.mrb[30].mxu0  ;;  %1644 = vmatprep.mubr.bf16.mxu1 %v843_v8 }
 0x1b2   : > { %v796_v14 = vadd.f32 %v1603_v13, %v2159_v47  ;;  %v787_v15 = vpop.f32.mrb[31].mxu0  ;;  %1645 = vmatmul.mubr.bf16.gmra.mrb[24].mxu1 %v844_v7  ;;  %v829_v17 = vmax.f32 %v793_v10, 0.0 }
 0x1b3   : > { %v788_v16 = vadd.f32 %v2159_v47, %v787_v15  ;;  %v827_v19 = vmax.f32 %v785_v12, 0.0 }
 0x1b4   : > { %v830_v18 = vmax.f32 %v796_v14, 0.0 }
 0x1b5   : > { %v828_v20 = vmax.f32 %v788_v16, 0.0 }
 0x1b6   : > { %v846_v21 = vpack.c.bf16 %v830_v18, %v829_v17 }
 0x1b7   : > { %v845_v22 = vpack.c.bf16 %v828_v20, %v827_v19 }
 0x1b9   : > { %1648 = vmatprep.mubr.bf16.mxu1 %v845_v22 }
 0x1ba   : > { %1649 = vmatmul.mubr.bf16.gmra.mrb[28].mxu1 %v846_v21 }
 0x255   : > { %v1622_v24 = vpop.f32.mrb[0].mxu1 }
 0x256   : > { %v2199_v25 = vadd.f32 %v1622_v24, %v2196_v23  ;;  %v952_v26 = vpop.f32.mrb[1].mxu1 }
 0x257   : > { %v1623_v27 = vpop.f32.mrb[2].mxu1  ;;  %v2206_v29 = vadd.f32 %v2196_v23, %v952_v26 }
 0x258   : > { %1083 = vmax.xlane.f32.xlu0 %v2199_v25  ;;  %v955_v47 = vpop.f32.mrb[3].mxu1  ;;  %v2211_v31 = vadd.f32 %v1623_v27, %v2196_v23 }
 0x259   : > { %v2203_v28 = vadd.f32 %v2196_v23, %v955_v47 }
 0x25b   : > { %1081 = vmax.xlane.f32.xlu1 %v2203_v28 }
 0x25c   : > { %1079 = vmax.xlane.f32.xlu0 %v2206_v29 }
 0x25d   : > { %v1626_v30 = vpop.f32.mrb[4].mxu1 }
 0x25e   : > { %v2214_v32 = vadd.f32 %v1626_v30, %v2196_v23  ;;  %v968_v33 = vpop.f32.mrb[5].mxu1 }
 0x25f   : > { %v1627_v34 = vpop.f32.mrb[6].mxu1  ;;  %v2219_v36 = vadd.f32 %v2196_v23, %v968_v33 }
 0x260   : > { %1085 = vmax.xlane.f32.xlu0 %v2211_v31  ;;  %1091 = vmax.xlane.f32.xlu1 %v2214_v32  ;;  %v971_v35 = vpop.f32.mrb[7].mxu1  ;;  %v2222_v52 = vadd.f32 %v1627_v34, %v2196_v23 }
 0x261   : > { %v2227_v38 = vadd.f32 %v2196_v23, %v971_v35 }
 0x264   : > { %1093 = vmax.xlane.f32.xlu0 %v2222_v52  ;;  %1087 = vmax.xlane.f32.xlu1 %v2219_v36 }
 0x265   : > { %v1630_v37 = vpop.f32.mrb[8].mxu1 }
 0x266   : > { %v2230_v39 = vadd.f32 %v1630_v37, %v2196_v23  ;;  %v984_v40 = vpop.f32.mrb[9].mxu1 }
 0x267   : > { %v1631_v41 = vpop.f32.mrb[10].mxu1  ;;  %v2235_v43 = vadd.f32 %v2196_v23, %v984_v40 }
 0x268   : > { %1089 = vmax.xlane.f32.xlu0 %v2227_v38  ;;  %1099 = vmax.xlane.f32.xlu1 %v2230_v39  ;;  %v987_v42 = vpop.f32.mrb[11].mxu1  ;;  %v2238_v44 = vadd.f32 %v1631_v41, %v2196_v23 }
 0x269   : > { %v2243_v46 = vadd.f32 %v2196_v23, %v987_v42 }
 0x26c   : > { %1101 = vmax.xlane.f32.xlu0 %v2238_v44  ;;  %1095 = vmax.xlane.f32.xlu1 %v2235_v43 }
 0x26d   : > { %v1634_v45 = vpop.f32.mrb[12].mxu1 }
 0x26e   : > { %v2246_v48 = vadd.f32 %v1634_v45, %v2196_v23  ;;  %v1000_v49 = vpop.f32.mrb[13].mxu1 }
 0x26f   : > { %v1635_v50 = vpop.f32.mrb[14].mxu1  ;;  %v2251_v53 = vadd.f32 %v2196_v23, %v1000_v49 }
 0x270   : > { %1097 = vmax.xlane.f32.xlu0 %v2243_v46  ;;  %1107 = vmax.xlane.f32.xlu1 %v2246_v48  ;;  %v1003_v51 = vpop.f32.mrb[15].mxu1  ;;  %v2254_v54 = vadd.f32 %v1635_v50, %v2196_v23 }
 0x271   : > { %v2259_v56 = vadd.f32 %v2196_v23, %v1003_v51 }
 0x274   : > { %1109 = vmax.xlane.f32.xlu0 %v2254_v54  ;;  %1103 = vmax.xlane.f32.xlu1 %v2251_v53 }
 0x275   : > { %v1638_v55 = vpop.f32.mrb[16].mxu1 }
 0x276   : > { %v2262_v57 = vadd.f32 %v1638_v55, %v2196_v23  ;;  %v1016_v58 = vpop.f32.mrb[17].mxu1 }
 0x277   : > { %v1639_v59 = vpop.f32.mrb[18].mxu1  ;;  %v2267_v61 = vadd.f32 %v2196_v23, %v1016_v58 }
 0x278   : > { %1105 = vmax.xlane.f32.xlu0 %v2259_v56  ;;  %1115 = vmax.xlane.f32.xlu1 %v2262_v57  ;;  %v1019_v60 = vpop.f32.mrb[19].mxu1  ;;  %v2270_v62 = vadd.f32 %v1639_v59, %v2196_v23 }
 0x279   : > { %v2275_v0 = vadd.f32 %v2196_v23, %v1019_v60 }
 0x27c   : > { %1117 = vmax.xlane.f32.xlu0 %v2270_v62  ;;  %1111 = vmax.xlane.f32.xlu1 %v2267_v61 }
 0x27d   : > { %v1642_v63 = vpop.f32.mrb[20].mxu1 }
 0x27e   : > { %v2278_v1 = vadd.f32 %v1642_v63, %v2196_v23  ;;  %v1032_v2 = vpop.f32.mrb[21].mxu1 }
 0x27f   : > { %v1643_v3 = vpop.f32.mrb[22].mxu1  ;;  %v2283_v5 = vadd.f32 %v2196_v23, %v1032_v2 }
 0x280   : > { %1113 = vmax.xlane.f32.xlu0 %v2275_v0  ;;  %1123 = vmax.xlane.f32.xlu1 %v2278_v1  ;;  %v1035_v4 = vpop.f32.mrb[23].mxu1  ;;  %v2286_v6 = vadd.f32 %v1643_v3, %v2196_v23 }
 0x281   : > { %v2291_v8 = vadd.f32 %v2196_v23, %v1035_v4 }
 0x284   : > { %1125 = vmax.xlane.f32.xlu0 %v2286_v6  ;;  %1119 = vmax.xlane.f32.xlu1 %v2283_v5 }
 0x285   : > { %v1646_v7 = vpop.f32.mrb[24].mxu1 }
 0x286   : > { %v2294_v9 = vadd.f32 %v1646_v7, %v2196_v23  ;;  %v1048_v10 = vpop.f32.mrb[25].mxu1 }
 0x287   : > { %v1647_v11 = vpop.f32.mrb[26].mxu1  ;;  %v2299_v13 = vadd.f32 %v2196_v23, %v1048_v10 }
 0x288   : > { %1121 = vmax.xlane.f32.xlu0 %v2291_v8  ;;  %1131 = vmax.xlane.f32.xlu1 %v2294_v9  ;;  %v1051_v12 = vpop.f32.mrb[27].mxu1  ;;  %v2302_v14 = vadd.f32 %v1647_v11, %v2196_v23 }
 0x289   : > { %v2307_v16 = vadd.f32 %v2196_v23, %v1051_v12 }
 0x28c   : > { %1133 = vmax.xlane.f32.xlu0 %v2302_v14  ;;  %1127 = vmax.xlane.f32.xlu1 %v2299_v13 }
 0x28d   : > { %v1650_v15 = vpop.f32.mrb[28].mxu1 }
 0x28e   : > { %v1064_v17 = vpop.f32.mrb[29].mxu1  ;;  %v2321_v24 = vadd.f32 %v1650_v15, %v2196_v23 }
 0x28f   : > { %v2310_v18 = vadd.f32 %v2196_v23, %v1064_v17  ;;  %v1651_v19 = vpop.f32.mrb[30].mxu1 }
 0x290   : > { %v2313_v20 = vadd.f32 %v1651_v19, %v2196_v23  ;;  %1129 = vmax.xlane.f32.xlu0 %v2307_v16  ;;  %v1067_v21 = vpop.f32.mrb[31].mxu1 }
 0x291   : > { %v2317_v22 = vadd.f32 %v2196_v23, %v1067_v21  ;;  %1135 = vmax.xlane.f32.xlu1 %v2310_v18 }
 0x294   : > { %1137 = vmax.xlane.f32.xlu0 %v2317_v22 }
 0x295   : > { %1139 = vmax.xlane.f32.xlu1 %v2321_v24 }
 0x298   : > { %1141 = vmax.xlane.f32.xlu0 %v2313_v20 }
 0x2e5   : > { %v1084_v26 = vpop.xlane.xlu0 %1083 }
 0x2e6   : > { %v1145_v27 = vsub.f32 %v2199_v25, %v1084_v26 }
 0x2e8   : > { %v1179_v47 = vmul.f32 1.442695, %v1145_v27  ;;  %v1082_v30 = vpop.xlane.xlu1 %1081 }
 0x2e9   : > { %v1080_v33 = vpop.xlane.xlu0 %1079  ;;  %v1144_v42 = vsub.f32 %v2203_v28, %v1082_v30 }
 0x2ea   : > { %1712 = vpow2.f32 %v1179_v47  ;;  %v1143_v34 = vsub.f32 %v2206_v29, %v1080_v33 }
 0x2eb   : > { %v1177_v55 = vmul.f32 1.442695, %v1144_v42 }
 0x2ec   : > { %v1175_v35 = vmul.f32 1.442695, %v1143_v34 }
 0x2ed   : > { %v1092_v37 = vpop.xlane.xlu1 %1091  ;;  %v1086_v40 = vpop.xlane.xlu0 %1085 }
 0x2ee   : > { %1714 = vpow2.f32 %v1175_v35  ;;  %v1149_v23 = vsub.f32 %v2214_v32, %v1092_v37  ;;  %v1146_v41 = vsub.f32 %v2211_v31, %v1086_v40 }
 0x2f0   : > { %v1187_v45 = vmul.f32 1.442695, %v1149_v23  ;;  %v1181_v49 = vmul.f32 1.442695, %v1146_v41 }
 0x2f1   : > { %v1088_v50 = vpop.xlane.xlu1 %1087  ;;  %v1094_v25 = vpop.xlane.xlu0 %1093 }
 0x2f2   : > { %1716 = vpow2.f32 %v1187_v45  ;;  %v1147_v51 = vsub.f32 %v2219_v36, %v1088_v50  ;;  %v1150_v29 = vsub.f32 %v2222_v52, %v1094_v25 }
 0x2f3   : > { %1718 = vpow2.f32 %v1181_v49 }
 0x2f4   : > { %v2333_v58 = vpop.eup %1712  ;;  %v1183_v59 = vmul.f32 1.442695, %v1147_v51  ;;  %v1189_v32 = vmul.f32 1.442695, %v1150_v29 }
 0x2f5   : > { %v1100_v60 = vpop.xlane.xlu1 %1099  ;;  %1243 = vadd.xlane.f32.xlu1 %v2333_v58  ;;  %v1090_v31 = vpop.xlane.xlu0 %1089 }
 0x2f6   : > { %1720 = vpow2.f32 %v1183_v59  ;;  %v1153_v28 = vsub.f32 %v2230_v39, %v1100_v60  ;;  %v1148_v63 = vsub.f32 %v2227_v38, %v1090_v31 }
 0x2f7   : > { %1722 = vpow2.f32 %v1177_v55 }
 0x2f8   : > { %v2338_v2 = vpop.eup %1714  ;;  %v1195_v36 = vmul.f32 1.442695, %v1153_v28  ;;  %v1185_v7 = vmul.f32 1.442695, %v1148_v63 }
 0x2f9   : > { %v1096_v3 = vpop.xlane.xlu1 %1095  ;;  %1239 = vadd.xlane.f32.xlu1 %v2338_v2  ;;  %v1102_v52 = vpop.xlane.xlu0 %1101 }
 0x2fa   : > { %1724 = vpow2.f32 %v1195_v36  ;;  %v1151_v4 = vsub.f32 %v2235_v43, %v1096_v3  ;;  %v1154_v10 = vsub.f32 %v2238_v44, %v1102_v52 }
 0x2fb   : > { %1726 = vpow2.f32 %v1189_v32 }
 0x2fc   : > { %v2343_v11 = vpop.eup %1716  ;;  %v1191_v39 = vmul.f32 1.442695, %v1151_v4  ;;  %v1197_v43 = vmul.f32 1.442695, %v1154_v10 }
 0x2fd   : > { %v2345_v12 = vpop.eup %1718  ;;  %v1108_v38 = vpop.xlane.xlu1 %1107  ;;  %1251 = vadd.xlane.f32.xlu1 %v2343_v11 }
 0x2fe   : > { %v1098_v15 = vpop.xlane.xlu0 %1097  ;;  %1728 = vpow2.f32 %v1191_v39  ;;  %v1157_v17 = vsub.f32 %v2246_v48, %v1108_v38  ;;  %1245 = vadd.xlane.f32.xlu0 %v2345_v12 }
 0x2ff   : > { %1730 = vpow2.f32 %v1185_v7  ;;  %v1152_v19 = vsub.f32 %v2243_v46, %v1098_v15 }
 0x300   : > { %v2351_v21 = vpop.eup %1720  ;;  %v1203_v44 = vmul.f32 1.442695, %v1157_v17 }
 0x301   : > { %v2353_v26 = vpop.eup %1722  ;;  %v1104_v27 = vpop.xlane.xlu1 %1103  ;;  %1247 = vadd.xlane.f32.xlu1 %v2351_v21  ;;  %v1193_v48 = vmul.f32 1.442695, %v1152_v19 }
 0x302   : > { %v1110_v47 = vpop.xlane.xlu0 %1109  ;;  %1732 = vpow2.f32 %v1203_v44  ;;  %v1155_v30 = vsub.f32 %v2251_v53, %v1104_v27  ;;  %1241 = vadd.xlane.f32.xlu0 %v2353_v26 }
 0x303   : > { %1734 = vpow2.f32 %v1197_v43  ;;  %v1158_v33 = vsub.f32 %v2254_v54, %v1110_v47 }
 0x304   : > { %v2359_v34 = vpop.eup %1724  ;;  %v1199_v46 = vmul.f32 1.442695, %v1155_v30 }
 0x305   : > { %v2361_v35 = vpop.eup %1726  ;;  %v1116_v37 = vpop.xlane.xlu1 %1115  ;;  %1259 = vadd.xlane.f32.xlu1 %v2359_v34  ;;  %v1205_v53 = vmul.f32 1.442695, %v1158_v33 }
 0x306   : > { %v1106_v40 = vpop.xlane.xlu0 %1105  ;;  %1736 = vpow2.f32 %v1199_v46  ;;  %v1161_v23 = vsub.f32 %v2262_v57, %v1116_v37  ;;  %1253 = vadd.xlane.f32.xlu0 %v2361_v35 }
 0x307   : > { %1738 = vpow2.f32 %v1193_v48  ;;  %v1156_v41 = vsub.f32 %v2259_v56, %v1106_v40 }
 0x308   : > { %v2367_v42 = vpop.eup %1728  ;;  %v1211_v54 = vmul.f32 1.442695, %v1161_v23 }
 0x309   : > { %v2369_v45 = vpop.eup %1730  ;;  %v1112_v49 = vpop.xlane.xlu1 %1111  ;;  %1255 = vadd.xlane.f32.xlu1 %v2367_v42  ;;  %v1201_v57 = vmul.f32 1.442695, %v1156_v41 }
 0x30a   : > { %v1118_v50 = vpop.xlane.xlu0 %1117  ;;  %1740 = vpow2.f32 %v1211_v54  ;;  %v1159_v25 = vsub.f32 %v2267_v61, %v1112_v49  ;;  %1249 = vadd.xlane.f32.xlu0 %v2369_v45 }
 0x30b   : > { %1742 = vpow2.f32 %v1205_v53  ;;  %v1162_v51 = vsub.f32 %v2270_v62, %v1118_v50 }
 0x30c   : > { %v2375_v55 = vpop.eup %1732  ;;  %v1207_v56 = vmul.f32 1.442695, %v1159_v25 }
 0x30d   : > { %v2377_v29 = vpop.eup %1734  ;;  %v1124_v59 = vpop.xlane.xlu1 %1123  ;;  %1267 = vadd.xlane.f32.xlu1 %v2375_v55  ;;  %v1213_v61 = vmul.f32 1.442695, %v1162_v51 }
 0x30e   : > { %v1114_v60 = vpop.xlane.xlu0 %1113  ;;  %1744 = vpow2.f32 %v1207_v56  ;;  %v1165_v31 = vsub.f32 %v2278_v1, %v1124_v59  ;;  %1261 = vadd.xlane.f32.xlu0 %v2377_v29 }
 0x30f   : > { %1746 = vpow2.f32 %v1201_v57  ;;  %v1160_v28 = vsub.f32 %v2275_v0, %v1114_v60 }
 0x310   : > { %v2383_v32 = vpop.eup %1736  ;;  %v1219_v62 = vmul.f32 1.442695, %v1165_v31 }
 0x311   : > { %v2385_v63 = vpop.eup %1738  ;;  %v1120_v36 = vpop.xlane.xlu1 %1119  ;;  %1263 = vadd.xlane.f32.xlu1 %v2383_v32  ;;  %v1209_v1 = vmul.f32 1.442695, %v1160_v28 }
 0x312   : > { %v1126_v3 = vpop.xlane.xlu0 %1125  ;;  %1748 = vpow2.f32 %v1219_v62  ;;  %v1163_v52 = vsub.f32 %v2283_v5, %v1120_v36  ;;  %1257 = vadd.xlane.f32.xlu0 %v2385_v63 }
 0x313   : > { %1750 = vpow2.f32 %v1213_v61  ;;  %v1166_v4 = vsub.f32 %v2286_v6, %v1126_v3 }
 0x314   : > { %v2391_v7 = vpop.eup %1740  ;;  %v1215_v0 = vmul.f32 1.442695, %v1163_v52 }
 0x315   : > { %v2393_v10 = vpop.eup %1742  ;;  %v1132_v39 = vpop.xlane.xlu1 %1131  ;;  %1275 = vadd.xlane.f32.xlu1 %v2391_v7  ;;  %v1221_v5 = vmul.f32 1.442695, %v1166_v4 }
 0x316   : > { %v1122_v38 = vpop.xlane.xlu0 %1121  ;;  %1752 = vpow2.f32 %v1215_v0  ;;  %v1169_v15 = vsub.f32 %v2294_v9, %v1132_v39  ;;  %1269 = vadd.xlane.f32.xlu0 %v2393_v10 }
 0x317   : > { %1754 = vpow2.f32 %v1209_v1  ;;  %v1164_v17 = vsub.f32 %v2291_v8, %v1122_v38 }
 0x318   : > { %v2399_v43 = vpop.eup %1744  ;;  %v1227_v6 = vmul.f32 1.442695, %v1169_v15 }
 0x319   : > { %v2401_v19 = vpop.eup %1746  ;;  %v1128_v44 = vpop.xlane.xlu1 %1127  ;;  %1271 = vadd.xlane.f32.xlu1 %v2399_v43  ;;  %v1217_v30 = vmul.f32 1.442695, %v1164_v17 }
 0x31a   : > { %v1134_v27 = vpop.xlane.xlu0 %1133  ;;  %1756 = vpow2.f32 %v1227_v6  ;;  %v1167_v47 = vsub.f32 %v2299_v13, %v1128_v44  ;;  %1265 = vadd.xlane.f32.xlu0 %v2401_v19 }
 0x31b   : > { %v1170_v9 = vsub.f32 %v2302_v14, %v1134_v27  ;;  %1758 = vpow2.f32 %v1221_v5 }
 0x31c   : > { %v2407_v48 = vpop.eup %1748  ;;  %v1223_v8 = vmul.f32 1.442695, %v1167_v47 }
 0x31d   : > { %v2409_v33 = vpop.eup %1750  ;;  %1283 = vadd.xlane.f32.xlu1 %v2407_v48  ;;  %v1229_v37 = vmul.f32 1.442695, %v1170_v9 }
 0x31e   : > { %v1130_v46 = vpop.xlane.xlu0 %1129  ;;  %1760 = vpow2.f32 %v1223_v8  ;;  %1277 = vadd.xlane.f32.xlu0 %v2409_v33  ;;  %v1136_v40 = vpop.xlane.xlu1 %1135 }
 0x31f   : > { %v1168_v13 = vsub.f32 %v2307_v16, %v1130_v46  ;;  %1762 = vpow2.f32 %v1217_v30  ;;  %v1171_v14 = vsub.f32 %v2310_v18, %v1136_v40 }
 0x320   : > { %v2415_v23 = vpop.eup %1752  ;;  %1764 = vpow2.f32 %v1229_v37 }
 0x321   : > { %v2417_v53 = vpop.eup %1754  ;;  %v1231_v41 = vmul.f32 1.442695, %v1171_v14  ;;  %1279 = vadd.xlane.f32.xlu1 %v2415_v23  ;;  %v1225_v49 = vmul.f32 1.442695, %v1168_v13 }
 0x322   : > { %v1138_v54 = vpop.xlane.xlu0 %1137  ;;  %1273 = vadd.xlane.f32.xlu0 %v2417_v53  ;;  %v1140_v50 = vpop.xlane.xlu1 %1139 }
 0x323   : > { %1766 = vpow2.f32 %v1231_v41  ;;  %v1172_v16 = vsub.f32 %v2317_v22, %v1138_v54  ;;  %v1173_v25 = vsub.f32 %v2321_v24, %v1140_v50 }
 0x324   : > { %v2423_v57 = vpop.eup %1756  ;;  %1768 = vpow2.f32 %v1225_v49 }
 0x325   : > { %v2425_v18 = vpop.eup %1758  ;;  %v1235_v51 = vmul.f32 1.442695, %v1173_v25  ;;  %1291 = vadd.xlane.f32.xlu1 %v2423_v57  ;;  %v1233_v59 = vmul.f32 1.442695, %v1172_v16 }
 0x326   : > { %v1142_v56 = vpop.xlane.xlu0 %1141  ;;  %1285 = vadd.xlane.f32.xlu0 %v2425_v18 }
 0x327   : > { %1770 = vpow2.f32 %v1235_v51  ;;  %v1174_v60 = vsub.f32 %v2313_v20, %v1142_v56 }
 0x328   : > { %v2430_v31 = vpop.eup %1760  ;;  %1772 = vpow2.f32 %v1233_v59 }
 0x329   : > { %v2432_v22 = vpop.eup %1762  ;;  %1287 = vadd.xlane.f32.xlu1 %v2430_v31  ;;  %v1237_v24 = vmul.f32 1.442695, %v1174_v60 }
 0x32a   : > { %1281 = vadd.xlane.f32.xlu0 %v2432_v22  ;;  %v2436_v61 = vpop.eup %1764 }
 0x32b   : > { %1774 = vpow2.f32 %v1237_v24 }
 0x32d   : > { %v2438_v28 = vpop.eup %1766 }
 0x32e   : > { %1293 = vadd.xlane.f32.xlu0 %v2436_v61  ;;  %1295 = vadd.xlane.f32.xlu1 %v2438_v28  ;;  %v2442_v20 = vpop.eup %1768 }
 0x331   : > { %v2444_v62 = vpop.eup %1770 }
 0x332   : > { %1289 = vadd.xlane.f32.xlu0 %v2442_v20  ;;  %1299 = vadd.xlane.f32.xlu1 %v2444_v62  ;;  %v2448_v36 = vpop.eup %1772 }
 0x335   : > { %v2451_v3 = vpop.eup %1774 }
 0x336   : > { %1297 = vadd.xlane.f32.xlu0 %v2448_v36 }
 0x33a   : > { %1301 = vadd.xlane.f32.xlu0 %v2451_v3 }
 0x382   : > { %v1244_v52 = vpop.xlane.xlu1 %1243 }
 0x383   : > { %1776 = vrcp.f32 %v1244_v52 }
 0x386   : > { %v1240_v1 = vpop.xlane.xlu1 %1239 }
 0x387   : > { %1778 = vrcp.f32 %v1240_v1 }
 0x38a   : > { %v1252_v4 = vpop.xlane.xlu1 %1251 }
 0x38b   : > { %1780 = vrcp.f32 %v1252_v4  ;;  %v1246_v0 = vpop.xlane.xlu0 %1245 }
 0x38c   : > { %1782 = vrcp.f32 %v1246_v0 }
 0x38d   : > { %v1777_v39 = vpop.eup %1776 }
 0x38e   : > { %v1337_v38 = vmul.f32 %v1777_v39, %v2333_v58  ;;  %v1248_v15 = vpop.xlane.xlu1 %1247 }
 0x38f   : > { %1784 = vrcp.f32 %v1248_v15  ;;  %v1242_v5 = vpop.xlane.xlu0 %1241 }
 0x390   : > { %1369 = vst [vmem:[%s2458_s18 + $0x10] sm:$0xff] %v1337_v38  ;;  %1786 = vrcp.f32 %v1242_v5 }
 0x391   : > { %v1779_v17 = vpop.eup %1778 }
 0x392   : > { %v1335_v6 = vmul.f32 %v1779_v17, %v2338_v2  ;;  %v1260_v44 = vpop.xlane.xlu1 %1259 }
 0x393   : > { %1788 = vrcp.f32 %v1260_v44  ;;  %v1254_v27 = vpop.xlane.xlu0 %1253 }
 0x394   : > { %1367 = vst [vmem:[%s2458_s18] sm:$0xff] %v1335_v6  ;;  %1790 = vrcp.f32 %v1254_v27 }
 0x395   : > { %v1781_v58 = vpop.eup %1780 }
 0x396   : > { %v1783_v47 = vpop.eup %1782  ;;  %v1341_v9 = vmul.f32 %v1781_v58, %v2343_v11  ;;  %v1256_v30 = vpop.xlane.xlu1 %1255 }
 0x397   : > { %v1338_v8 = vmul.f32 %v1783_v47, %v2345_v12  ;;  %1792 = vrcp.f32 %v1256_v30  ;;  %v1250_v46 = vpop.xlane.xlu0 %1249 }
 0x398   : > { %1373 = vst [vmem:[%s2458_s18 + $0x30] sm:$0xff] %v1341_v9  ;;  %1794 = vrcp.f32 %v1250_v46 }
 0x399   : > { %v1785_v2 = vpop.eup %1784  ;;  %1370 = vst [vmem:[%s2458_s18 + $0x18] sm:$0xff] %v1338_v8 }
 0x39a   : > { %v1787_v37 = vpop.eup %1786  ;;  %v1339_v13 = vmul.f32 %v1785_v2, %v2351_v21  ;;  %v1268_v40 = vpop.xlane.xlu1 %1267 }
 0x39b   : > { %v1336_v14 = vmul.f32 %v1787_v37, %v2353_v26  ;;  %1796 = vrcp.f32 %v1268_v40  ;;  %v1262_v11 = vpop.xlane.xlu0 %1261 }
 0x39c   : > { %1371 = vst [vmem:[%s2458_s18 + $0x20] sm:$0xff] %v1339_v13  ;;  %1798 = vrcp.f32 %v1262_v11 }
 0x39d   : > { %v1789_v12 = vpop.eup %1788  ;;  %1368 = vst [vmem:[%s2458_s18 + $0x8] sm:$0xff] %v1336_v14 }
 0x39e   : > { %v1791_v41 = vpop.eup %1790  ;;  %v1345_v54 = vmul.f32 %v1789_v12, %v2359_v34  ;;  %v1264_v49 = vpop.xlane.xlu1 %1263 }
 0x39f   : > { %v1342_v50 = vmul.f32 %v1791_v41, %v2361_v35  ;;  %1800 = vrcp.f32 %v1264_v49  ;;  %v1258_v21 = vpop.xlane.xlu0 %1257 }
 0x3a0   : > { %1377 = vst [vmem:[%s2458_s18 + $0x50] sm:$0xff] %v1345_v54  ;;  %1802 = vrcp.f32 %v1258_v21 }
 0x3a1   : > { %v1793_v26 = vpop.eup %1792  ;;  %1374 = vst [vmem:[%s2458_s18 + $0x38] sm:$0xff] %v1342_v50 }
 0x3a2   : > { %v1795_v16 = vpop.eup %1794  ;;  %v1343_v25 = vmul.f32 %v1793_v26, %v2367_v42  ;;  %v1276_v51 = vpop.xlane.xlu1 %1275 }
 0x3a3   : > { %v1340_v56 = vmul.f32 %v1795_v16, %v2369_v45  ;;  %1804 = vrcp.f32 %v1276_v51  ;;  %v1270_v34 = vpop.xlane.xlu0 %1269 }
 0x3a4   : > { %1375 = vst [vmem:[%s2458_s18 + $0x40] sm:$0xff] %v1343_v25  ;;  %1806 = vrcp.f32 %v1270_v34 }
 0x3a5   : > { %v1797_v35 = vpop.eup %1796  ;;  %1372 = vst [vmem:[%s2458_s18 + $0x28] sm:$0xff] %v1340_v56 }
 0x3a6   : > { %v1799_v59 = vpop.eup %1798  ;;  %v1349_v60 = vmul.f32 %v1797_v35, %v2375_v55  ;;  %v1272_v24 = vpop.xlane.xlu1 %1271 }
 0x3a7   : > { %v1346_v52 = vmul.f32 %v1799_v59, %v2377_v29  ;;  %1808 = vrcp.f32 %v1272_v24  ;;  %v1266_v42 = vpop.xlane.xlu0 %1265 }
 0x3a8   : > { %1381 = vst [vmem:[%s2458_s18 + $0x70] sm:$0xff] %v1349_v60  ;;  %1810 = vrcp.f32 %v1266_v42 }
 0x3a9   : > { %v1801_v45 = vpop.eup %1800  ;;  %1378 = vst [vmem:[%s2458_s18 + $0x58] sm:$0xff] %v1346_v52 }
 0x3aa   : > { %v1803_v1 = vpop.eup %1802  ;;  %v1347_v4 = vmul.f32 %v1801_v45, %v2383_v32  ;;  %v1284_v0 = vpop.xlane.xlu1 %1283 }
 0x3ab   : > { %v1344_v39 = vmul.f32 %v1803_v1, %v2385_v63  ;;  %1812 = vrcp.f32 %v1284_v0  ;;  %v1278_v55 = vpop.xlane.xlu0 %1277 }
 0x3ac   : > { %1379 = vst [vmem:[%s2458_s18 + $0x60] sm:$0xff] %v1347_v4  ;;  %1814 = vrcp.f32 %v1278_v55 }
 0x3ad   : > { %v1805_v29 = vpop.eup %1804  ;;  %1376 = vst [vmem:[%s2458_s18 + $0x48] sm:$0xff] %v1344_v39 }
 0x3ae   : > { %v1807_v38 = vpop.eup %1806  ;;  %v1353_v15 = vmul.f32 %v1805_v29, %v2391_v7  ;;  %v1280_v5 = vpop.xlane.xlu1 %1279 }
 0x3af   : > { %v1350_v17 = vmul.f32 %v1807_v38, %v2393_v10  ;;  %1816 = vrcp.f32 %v1280_v5  ;;  %v1274_v32 = vpop.xlane.xlu0 %1273 }
 0x3b0   : > { %1385 = vst [vmem:[%s2458_s18 + $0x90] sm:$0xff] %v1353_v15  ;;  %1818 = vrcp.f32 %v1274_v32 }
 0x3b1   : > { %v1809_v63 = vpop.eup %1808  ;;  %1382 = vst [vmem:[%s2458_s18 + $0x78] sm:$0xff] %v1350_v17 }
 0x3b2   : > { %v1811_v6 = vpop.eup %1810  ;;  %v1351_v44 = vmul.f32 %v1809_v63, %v2399_v43  ;;  %v1292_v27 = vpop.xlane.xlu1 %1291 }
 0x3b3   : > { %v1348_v58 = vmul.f32 %v1811_v6, %v2401_v19  ;;  %1820 = vrcp.f32 %v1292_v27  ;;  %v1286_v7 = vpop.xlane.xlu0 %1285 }
 0x3b4   : > { %1383 = vst [vmem:[%s2458_s18 + $0x80] sm:$0xff] %v1351_v44  ;;  %1822 = vrcp.f32 %v1286_v7 }
 0x3b5   : > { %v1813_v10 = vpop.eup %1812  ;;  %1380 = vst [vmem:[%s2458_s18 + $0x68] sm:$0xff] %v1348_v58 }
 0x3b6   : > { %v1815_v47 = vpop.eup %1814  ;;  %v1357_v9 = vmul.f32 %v1813_v10, %v2407_v48  ;;  %v1288_v30 = vpop.xlane.xlu1 %1287 }
 0x3b7   : > { %v1354_v8 = vmul.f32 %v1815_v47, %v2409_v33  ;;  %1824 = vrcp.f32 %v1288_v30  ;;  %v1282_v43 = vpop.xlane.xlu0 %1281 }
 0x3b8   : > { %1389 = vst [vmem:[%s2458_s18 + $0xb0] sm:$0xff] %v1357_v9  ;;  %1826 = vrcp.f32 %v1282_v43 }
 0x3b9   : > { %v1817_v19 = vpop.eup %1816  ;;  %1386 = vst [vmem:[%s2458_s18 + $0x98] sm:$0xff] %v1354_v8 }
 0x3ba   : > { %v1819_v46 = vpop.eup %1818  ;;  %v1355_v2 = vmul.f32 %v1817_v19, %v2415_v23 }
 0x3bb   : > { %v1352_v37 = vmul.f32 %v1819_v46, %v2417_v53  ;;  %v1294_v13 = vpop.xlane.xlu0 %1293  ;;  %v1296_v40 = vpop.xlane.xlu1 %1295 }
 0x3bc   : > { %1387 = vst [vmem:[%s2458_s18 + $0xa0] sm:$0xff] %v1355_v2  ;;  %1828 = vrcp.f32 %v1294_v13 }
 0x3bd   : > { %v1821_v48 = vpop.eup %1820  ;;  %1384 = vst [vmem:[%s2458_s18 + $0x88] sm:$0xff] %v1352_v37  ;;  %1830 = vrcp.f32 %v1296_v40 }
 0x3be   : > { %v1823_v33 = vpop.eup %1822  ;;  %v1361_v14 = vmul.f32 %v1821_v48, %v2423_v57 }
 0x3bf   : > { %v1358_v11 = vmul.f32 %v1823_v33, %v2425_v18  ;;  %v1290_v12 = vpop.xlane.xlu0 %1289  ;;  %v1300_v41 = vpop.xlane.xlu1 %1299 }
 0x3c0   : > { %1393 = vst [vmem:[%s2458_s18 + $0xd0] sm:$0xff] %v1361_v14  ;;  %1832 = vrcp.f32 %v1290_v12 }
 0x3c1   : > { %v1825_v23 = vpop.eup %1824  ;;  %1390 = vst [vmem:[%s2458_s18 + $0xb8] sm:$0xff] %v1358_v11  ;;  %1834 = vrcp.f32 %v1300_v41 }
 0x3c2   : > { %v1827_v53 = vpop.eup %1826  ;;  %v1359_v54 = vmul.f32 %v1825_v23, %v2430_v31 }
 0x3c3   : > { %v1356_v49 = vmul.f32 %v1827_v53, %v2432_v22  ;;  %v1298_v50 = vpop.xlane.xlu0 %1297 }
 0x3c4   : > { %1391 = vst [vmem:[%s2458_s18 + $0xc0] sm:$0xff] %v1359_v54  ;;  %1836 = vrcp.f32 %v1298_v50 }
 0x3c5   : > { %1388 = vst [vmem:[%s2458_s18 + $0xa8] sm:$0xff] %v1356_v49 }
 0x3c6   : > { %v1829_v57 = vpop.eup %1828 }
 0x3c7   : > { %v1831_v18 = vpop.eup %1830  ;;  %v1362_v21 = vmul.f32 %v1829_v57, %v2436_v61  ;;  %v1302_v26 = vpop.xlane.xlu0 %1301 }
 0x3c8   : > { %v1363_v16 = vmul.f32 %v1831_v18, %v2438_v28  ;;  %1838 = vrcp.f32 %v1302_v26 }
 0x3c9   : > { %1394 = vst [vmem:[%s2458_s18 + $0xd8] sm:$0xff] %v1362_v21 }
 0x3ca   : > { %v1833_v31 = vpop.eup %1832  ;;  %1395 = vst [vmem:[%s2458_s18 + $0xe0] sm:$0xff] %v1363_v16 }
 0x3cb   : > { %v1835_v22 = vpop.eup %1834  ;;  %v1360_v25 = vmul.f32 %v1833_v31, %v2442_v20 }
 0x3cc   : > { %v1365_v51 = vmul.f32 %v1835_v22, %v2444_v62 }
 0x3cd   : > { %1392 = vst [vmem:[%s2458_s18 + $0xc8] sm:$0xff] %v1360_v25 }
 0x3ce   : > { %v1837_v56 = vpop.eup %1836  ;;  %1397 = vst [vmem:[%s2458_s18 + $0xf0] sm:$0xff] %v1365_v51 }
 0x3cf   : > { %v1364_v61 = vmul.f32 %v1837_v56, %v2448_v36 }
 0x3d1   : > { %1396 = vst [vmem:[%s2458_s18 + $0xe8] sm:$0xff] %v1364_v61 }
 0x3d2   : > { %v1839_v28 = vpop.eup %1838 }
 0x3d3   : > { %v1366_v20 = vmul.f32 %v1839_v28, %v2451_v3 }
 0x3d5   : > { %1398 = vst [vmem:[%s2458_s18 + $0xf8] sm:$0xff] %v1366_v20 }
 0x3d6   : > { %1853 = shalt.err (!%p1850_p3)
}
 0x3d7   : > { %s1854_s14 = scalar_lea.hbm %s2526_s29, 4096  ;;  %s1858_s17 = scalar_lea.hbm %s2582_s7, 12288 }
 0x3d8   : > { %p1855_p4 = scmp.ne.s32.totalorder %s2526_s29, %s1854_s14  ;;  %p1859_p9 = scmp.lt.u32.totalorder %s2526_s29, %s2582_s7 }
 0x3d9   : > { %p1860_p10 = scmp.lt.u32.totalorder %s1858_s17, %s1854_s14  ;;  %p1862_p12 = scmp.lt.u32.totalorder %s1854_s14, %s2526_s29 }
 0x3da   : > { %p1856_p7 = pnand %p1855_p4, %p1986_p5 }
 0x3db   : > { %p1861_p11 = por %p1860_p10, %p1859_p9 }
 0x3dc   : > { %p1857_p8 = pneg %p1856_p7 }
 0x3dd   : > { %p1863_p13 = por %p1862_p12, %p1861_p11 }
 0x3df   : > { %p1864_p0 = pnand %p1863_p13, %p1857_p8 }
 0x3e1   : > { %1867 = shalt.err (!%p1864_p0)
}
 0x3e2   : > { %s1906_s22 = smov 128   ;;  %s1907_s23 = smov 8  }
 0x3e3   : > { %1652 = dma.vmem_to_hbm [thread:$0]  (%p1986_p5), %s2528_s20, 4096, %s2526_s29, %s2534_s8, %s1906_s22, %s1906_s22, %s1907_s23  }
 0x3e4 PF: > { %p1658_p1 = scmp.ge.s32.totalorder %s1902_s27, 2  ;;  %s1428_s28 = sand.u32 1, %s1890_s24  }
 0x3e5   : > { %s1429_s9 = scalar_lea.sflag [#allocation3], %s1428_s28 }
 0x3e6   : > { %p1655_p2 = pnand %p1658_p1, %p1990_p6 }
 0x3e8   : > { %1885 = dma.done.wait (!%p1655_p2), %s1429_s9, 4096  }
 0x3e9   : > { %1887 = vsyncadd (!%p1655_p2), %s1429_s9, 4294963200  ;;  %p17_p3 = scmp.ge.s32.totalorder %s1973_s30, 5   ;;  %s2585_s24 = smov %s1894_s25 }
 0x3ea   : > { %s2586_s25 = smov %s1898_s26  ;;  %s2587_s26 = smov %s1984_s10 }
 0x3eb   : > { %s2588_s27 = smov %s1973_s30  ;;  %19 = sbr.rel (!%p17_p3) target bundleno = 3 (0x3), region = 83 }
 0x3f2   :  { %1434 = vsyncpa [#allocation3], 1 }
 0x3f3   :  { %1436 = vsyncpa [#allocation3 + $0x1], 1 }

</bundles_post_ra>
